<compile_context>
chip_gen: v7x
topology: tpu7x:2x2x1
jax: 0.10.0
libtpu: 0.0.40
codegen_flags: <defaults>
</compile_context>

<pallas_src>
import functools

import jax
import jax.numpy as jnp
from jax import lax
from jax.experimental import pallas as pl
from jax.experimental.pallas import tpu as pltpu


def texture_kernel(texd_ref, u_ref, v_ref, seg_ref, out_ref, *,
                   num_classes, tex_size, color):
    C = num_classes
    T = tex_size
    NB = u_ref.shape[-1]

    # --- softmax over the (C+1) class channels (sublane axis) ---
    seg = seg_ref[...]                                       # (C+1, NB) logits, f32
    m = jnp.max(seg, axis=0, keepdims=True)
    e = jnp.exp(seg - m)
    inv = pl.reciprocal(jnp.sum(e, axis=0, keepdims=True), approx=True)  # EUP slot
    proba = e * inv                                          # (C+1, NB)

    # --- grid_sample coordinate unnormalization (align_corners=False) ---
    ix = ((u_ref[...] + 1.0) * T - 1.0) * 0.5                # (C, NB)  x -> texture width
    iy = ((v_ref[...] + 1.0) * T - 1.0) * 0.5                # (C, NB)  y -> texture height
    ix0f = jnp.floor(ix)
    iy0f = jnp.floor(iy)
    fx = (ix - ix0f)[:, None, :]                             # (C, 1, NB)
    fy = (iy - iy0f)[:, None, :]
    ix0 = ix0f.astype(jnp.int32)[:, None, :]
    iy0 = iy0f.astype(jnp.int32)[:, None, :]

    # --- separable one-hot bilinear weights, built in f32 ---
    # Out-of-bounds texel indices never match t_iota -> padding_mode='zeros'.
    t_iota = lax.broadcasted_iota(jnp.int32, (C, T, NB), 1)
    wy = (jnp.where(t_iota == iy0, 1.0 - fy, 0.0)
          + jnp.where(t_iota == iy0 + 1, fy, 0.0))           # (C, T, NB)
    wx = (jnp.where(t_iota == ix0, 1.0 - fx, 0.0)
          + jnp.where(t_iota == ix0 + 1, fx, 0.0))           # (C, T, NB)
    wx = wx * proba[1:][:, None, :]                          # fold class probability in

    # --- single fused y-contraction on the MXU (bf16 operands, f32 acc) ---
    wy_b = wy.reshape(C * T, NB).astype(jnp.bfloat16)
    r = jnp.dot(texd_ref[...], wy_b,
                preferred_element_type=jnp.float32)          # (C*3*T, NB) f32

    # --- x-contraction + class accumulation on the VPU/XLU ---
    # TODO(synk): for large C switch this static unroll to lax.fori_loop.
    acc = jnp.zeros((3, NB), jnp.float32) + color * proba[0:1, :]   # background bias
    for c in range(C):                                       # static: C is small
        rc = r[c * 3 * T:(c + 1) * 3 * T, :].reshape(3, T, NB)
        acc = acc + jnp.sum(rc * wx[c][None, :, :], axis=1)
    out_ref[...] = acc


def texture_model_forward(texture, uv_gen, uv_seg_gen, color=-1.0, n_block=256):
    """texture: (C, 3, T, T); uv_gen: (B, 2C, H, W); uv_seg_gen: (B, C+1, H, W)."""
    B, two_c, H, W = uv_gen.shape
    C, _, T, _ = texture.shape
    assert two_c == 2 * C and uv_seg_gen.shape[1] == C + 1
    Ntot = B * H * W

    # Collapse batch into the pixel (lane) axis -> large lane-dense slabs.
    u = jnp.transpose(uv_gen[:, :C], (1, 0, 2, 3)).reshape(C, Ntot).astype(jnp.float32)
    v = jnp.transpose(uv_gen[:, C:], (1, 0, 2, 3)).reshape(C, Ntot).astype(jnp.float32)
    seg = jnp.transpose(uv_seg_gen, (1, 0, 2, 3)).reshape(C + 1, Ntot).astype(jnp.float32)

    # Pad the pixel axis to a multiple of the lane tile (multiple of 128).
    NB = int(n_block)
    assert NB % 128 == 0
    n_tiles = pl.cdiv(Ntot, NB)
    Npad = n_tiles * NB
    if Npad != Ntot:
        pad = Npad - Ntot
        u = jnp.pad(u, ((0, 0), (0, pad)))
        v = jnp.pad(v, ((0, 0), (0, pad)))
        seg = jnp.pad(seg, ((0, 0), (0, pad)))

    # Block-diagonal texture operand for the single fused y-contraction:
    #   texd[(c, ch, tx), (d, ty)] = texture[c, ch, ty, tx] * (c == d)
    tex_t = jnp.transpose(texture, (0, 1, 3, 2)).reshape(C, 3 * T, T).astype(jnp.float32)
    texd = jnp.einsum('cmt,cd->cmdt', tex_t, jnp.eye(C, dtype=jnp.float32))
    texd = texd.reshape(C * 3 * T, C * T).astype(jnp.bfloat16)

    kernel = functools.partial(texture_kernel, num_classes=C, tex_size=T,
                               color=float(color))
    out = pl.pallas_call(
        kernel,
        out_shape=jax.ShapeDtypeStruct((3, Npad), jnp.float32),
        grid=(n_tiles,),
        in_specs=[
            pl.BlockSpec((C * 3 * T, C * T), lambda i: (0, 0)),   # block-diag texture
            pl.BlockSpec((C, NB), lambda i: (0, i)),              # u
            pl.BlockSpec((C, NB), lambda i: (0, i)),              # v
            pl.BlockSpec((C + 1, NB), lambda i: (0, i)),          # seg logits
        ],
        out_specs=pl.BlockSpec((3, NB), lambda i: (0, i)),
        compiler_params=pltpu.CompilerParams(dimension_semantics=("parallel",)),
    )(texd, u, v, seg)

    out = out[:, :Ntot].reshape(3, B, H, W)
    return jnp.transpose(out, (1, 0, 2, 3))


def ref_forward(texture, uv_gen, uv_seg_gen, color=-1.0):
    """Pure-JAX f32 reference replicating torch grid_sample (bilinear, zeros, align_corners=False)."""
    B, _, H, W = uv_gen.shape
    C, _, T, _ = texture.shape
    u = uv_gen[:, :C]
    v = uv_gen[:, C:]
    p = jax.nn.softmax(uv_seg_gen, axis=1)
    acc = jnp.zeros((B, 3, H, W), jnp.float32)
    for c in range(C):
        x = u[:, c]
        y = v[:, c]
        ix = ((x + 1.0) * T - 1.0) * 0.5
        iy = ((y + 1.0) * T - 1.0) * 0.5
        ix0 = jnp.floor(ix)
        iy0 = jnp.floor(iy)
        fx = ix - ix0
        fy = iy - iy0
        ix0 = ix0.astype(jnp.int32)
        iy0 = iy0.astype(jnp.int32)
        tex = texture[c]                                     # (3, T, T)
        samp = jnp.zeros((B, 3, H, W), jnp.float32)
        for dx, dy, w in ((0, 0, (1 - fx) * (1 - fy)), (1, 0, fx * (1 - fy)),
                          (0, 1, (1 - fx) * fy), (1, 1, fx * fy)):
            cx = ix0 + dx
            cy = iy0 + dy
            valid = (cx >= 0) & (cx < T) & (cy >= 0) & (cy < T)
            cxc = jnp.clip(cx, 0, T - 1)
            cyc = jnp.clip(cy, 0, T - 1)
            vals = jnp.transpose(tex[:, cyc, cxc], (1, 0, 2, 3))   # (B, 3, H, W)
            samp = samp + vals * jnp.where(valid, w, 0.0)[:, None]
        acc = acc + samp * p[:, c + 1][:, None]
    return acc + color * p[:, :1]


if __name__ == "__main__":
    key = jax.random.PRNGKey(0)
    k_tex, k_uv, k_seg = jax.random.split(key, 3)

    # Small shapes consistent with the module: num_classes=4, texture_size=8.
    B, C, H, W, T = 2, 4, 16, 16, 8
    texture = jax.random.normal(k_tex, (C, 3, T, T), jnp.float32)       # synthetic texture param
    uv_gen = jax.random.uniform(k_uv, (B, 2 * C, H, W), jnp.float32,
                                minval=-1.2, maxval=1.2)                # exercises zero padding
    uv_seg_gen = jax.random.normal(k_seg, (B, C + 1, H, W), jnp.float32)

    out = jax.block_until_ready(texture_model_forward(texture, uv_gen, uv_seg_gen, color=-1.0))

    ref = ref_forward(texture, uv_gen, uv_seg_gen, color=-1.0)
    assert out.shape == (B, 3, H, W)
    # Tolerance accounts for bf16 MXU operands (f32 accumulation); the f32
    # elementwise path contributes ~1e-5.
    err = float(jnp.max(jnp.abs(out - ref)))
    assert err < 5e-2, f"mismatch vs reference: {err}"

    print("KERNEL_OK")
</pallas_src>

<mosaic_0001>
module attributes {stable_mosaic.version = 11 : i64} {
  func.func @texture_kernel(%arg0: i32, %arg1: memref<96x32xbf16, #tpu.memory_space<vmem>>, %arg2: memref<4x256xf32, #tpu.memory_space<vmem>>, %arg3: memref<4x256xf32, #tpu.memory_space<vmem>>, %arg4: memref<5x256xf32, #tpu.memory_space<vmem>>, %arg5: memref<3x256xf32, #tpu.memory_space<vmem>>) attributes {dimension_semantics = [#tpu.dimension_semantics<parallel>], iteration_bounds = array<i64: 2>, scalar_prefetch = 0 : i64, scratch_operands = 0 : i64, tpu.core_type = #tpu.core_type<tc>, window_params = [{pipeline_mode = #tpu.pipeline_mode<synchronous>, transform_indices = @transform_0, window_bounds = array<i64: 96, 32>}, {transform_indices = @transform_1, window_bounds = array<i64: 4, 256>}, {transform_indices = @transform_2, window_bounds = array<i64: 4, 256>}, {transform_indices = @transform_3, window_bounds = array<i64: 5, 256>}, {transform_indices = @transform_4, window_bounds = array<i64: 3, 256>}]} {
    %c0 = arith.constant 0 : index
    %c0_0 = arith.constant 0 : index
    %0 = vector.load %arg4[%c0, %c0_0] : memref<5x256xf32, #tpu.memory_space<vmem>>, vector<5x256xf32>
    %cst = arith.constant dense<0xFF800000> : vector<256xf32>
    %1 = vector.multi_reduction <maximumf>, %0, %cst [0] : vector<5x256xf32> to vector<256xf32>
    %2 = vector.shape_cast %1 : vector<256xf32> to vector<1x256xf32>
    %3 = vector.broadcast %2 : vector<1x256xf32> to vector<5x256xf32>
    %4 = arith.subf %0, %3 : vector<5x256xf32>
    %5 = math.exp %4 : vector<5x256xf32>
    %cst_1 = arith.constant dense<0.000000e+00> : vector<256xf32>
    %6 = vector.multi_reduction <add>, %5, %cst_1 [0] : vector<5x256xf32> to vector<256xf32>
    %7 = vector.shape_cast %6 : vector<256xf32> to vector<1x256xf32>
    %8 = tpu.reciprocal %7 {approx = true} : vector<1x256xf32> -> vector<1x256xf32>
    %9 = vector.broadcast %8 : vector<1x256xf32> to vector<5x256xf32>
    %10 = arith.mulf %5, %9 : vector<5x256xf32>
    %c0_2 = arith.constant 0 : index
    %c0_3 = arith.constant 0 : index
    %11 = vector.load %arg2[%c0_2, %c0_3] : memref<4x256xf32, #tpu.memory_space<vmem>>, vector<4x256xf32>
    %cst_4 = arith.constant 1.000000e+00 : f32
    %12 = vector.broadcast %cst_4 : f32 to vector<4x256xf32>
    %13 = arith.addf %11, %12 : vector<4x256xf32>
    %cst_5 = arith.constant 8.000000e+00 : f32
    %14 = vector.broadcast %cst_5 : f32 to vector<4x256xf32>
    %15 = arith.mulf %13, %14 : vector<4x256xf32>
    %cst_6 = arith.constant 1.000000e+00 : f32
    %16 = vector.broadcast %cst_6 : f32 to vector<4x256xf32>
    %17 = arith.subf %15, %16 : vector<4x256xf32>
    %cst_7 = arith.constant 5.000000e-01 : f32
    %18 = vector.broadcast %cst_7 : f32 to vector<4x256xf32>
    %19 = arith.mulf %17, %18 : vector<4x256xf32>
    %c0_8 = arith.constant 0 : index
    %c0_9 = arith.constant 0 : index
    %20 = vector.load %arg3[%c0_8, %c0_9] : memref<4x256xf32, #tpu.memory_space<vmem>>, vector<4x256xf32>
    %cst_10 = arith.constant 1.000000e+00 : f32
    %21 = vector.broadcast %cst_10 : f32 to vector<4x256xf32>
    %22 = arith.addf %20, %21 : vector<4x256xf32>
    %cst_11 = arith.constant 8.000000e+00 : f32
    %23 = vector.broadcast %cst_11 : f32 to vector<4x256xf32>
    %24 = arith.mulf %22, %23 : vector<4x256xf32>
    %cst_12 = arith.constant 1.000000e+00 : f32
    %25 = vector.broadcast %cst_12 : f32 to vector<4x256xf32>
    %26 = arith.subf %24, %25 : vector<4x256xf32>
    %cst_13 = arith.constant 5.000000e-01 : f32
    %27 = vector.broadcast %cst_13 : f32 to vector<4x256xf32>
    %28 = arith.mulf %26, %27 : vector<4x256xf32>
    %29 = math.floor %19 : vector<4x256xf32>
    %30 = math.floor %28 : vector<4x256xf32>
    %31 = arith.subf %19, %29 : vector<4x256xf32>
    %32 = vector.shape_cast %31 : vector<4x256xf32> to vector<4x1x256xf32>
    %33 = arith.subf %28, %30 : vector<4x256xf32>
    %34 = vector.shape_cast %33 : vector<4x256xf32> to vector<4x1x256xf32>
    %35 = arith.fptosi %29 : vector<4x256xf32> to vector<4x256xi32>
    %36 = vector.shape_cast %35 : vector<4x256xi32> to vector<4x1x256xi32>
    %37 = arith.fptosi %30 : vector<4x256xf32> to vector<4x256xi32>
    %38 = vector.shape_cast %37 : vector<4x256xi32> to vector<4x1x256xi32>
    %39 = tpu.iota {dimensions = array<i32: 1>} : vector<4x8x256xi32>
    %40 = vector.broadcast %38 : vector<4x1x256xi32> to vector<4x8x256xi32>
    %41 = arith.cmpi eq, %39, %40 : vector<4x8x256xi32>
    %cst_14 = arith.constant 1.000000e+00 : f32
    %42 = vector.broadcast %cst_14 : f32 to vector<4x1x256xf32>
    %43 = arith.subf %42, %34 : vector<4x1x256xf32>
    %cst_15 = arith.constant 0.000000e+00 : f32
    %44 = vector.shape_cast %43 : vector<4x1x256xf32> to vector<4x1x256xf32>
    %45 = vector.broadcast %44 : vector<4x1x256xf32> to vector<4x8x256xf32>
    %46 = vector.broadcast %cst_15 : f32 to vector<4x8x256xf32>
    %47 = arith.select %41, %45, %46 : vector<4x8x256xi1>, vector<4x8x256xf32>
    %c1_i32 = arith.constant 1 : i32
    %48 = vector.broadcast %c1_i32 : i32 to vector<4x1x256xi32>
    %49 = arith.addi %38, %48 : vector<4x1x256xi32>
    %50 = vector.broadcast %49 : vector<4x1x256xi32> to vector<4x8x256xi32>
    %51 = arith.cmpi eq, %39, %50 : vector<4x8x256xi32>
    %cst_16 = arith.constant 0.000000e+00 : f32
    %52 = vector.shape_cast %34 : vector<4x1x256xf32> to vector<4x1x256xf32>
    %53 = vector.broadcast %52 : vector<4x1x256xf32> to vector<4x8x256xf32>
    %54 = vector.broadcast %cst_16 : f32 to vector<4x8x256xf32>
    %55 = arith.select %51, %53, %54 : vector<4x8x256xi1>, vector<4x8x256xf32>
    %56 = arith.addf %47, %55 : vector<4x8x256xf32>
    %57 = vector.broadcast %36 : vector<4x1x256xi32> to vector<4x8x256xi32>
    %58 = arith.cmpi eq, %39, %57 : vector<4x8x256xi32>
    %cst_17 = arith.constant 1.000000e+00 : f32
    %59 = vector.broadcast %cst_17 : f32 to vector<4x1x256xf32>
    %60 = arith.subf %59, %32 : vector<4x1x256xf32>
    %cst_18 = arith.constant 0.000000e+00 : f32
    %61 = vector.shape_cast %60 : vector<4x1x256xf32> to vector<4x1x256xf32>
    %62 = vector.broadcast %61 : vector<4x1x256xf32> to vector<4x8x256xf32>
    %63 = vector.broadcast %cst_18 : f32 to vector<4x8x256xf32>
    %64 = arith.select %58, %62, %63 : vector<4x8x256xi1>, vector<4x8x256xf32>
    %c1_i32_19 = arith.constant 1 : i32
    %65 = vector.broadcast %c1_i32_19 : i32 to vector<4x1x256xi32>
    %66 = arith.addi %36, %65 : vector<4x1x256xi32>
    %67 = vector.broadcast %66 : vector<4x1x256xi32> to vector<4x8x256xi32>
    %68 = arith.cmpi eq, %39, %67 : vector<4x8x256xi32>
    %cst_20 = arith.constant 0.000000e+00 : f32
    %69 = vector.shape_cast %32 : vector<4x1x256xf32> to vector<4x1x256xf32>
    %70 = vector.broadcast %69 : vector<4x1x256xf32> to vector<4x8x256xf32>
    %71 = vector.broadcast %cst_20 : f32 to vector<4x8x256xf32>
    %72 = arith.select %68, %70, %71 : vector<4x8x256xi1>, vector<4x8x256xf32>
    %73 = arith.addf %64, %72 : vector<4x8x256xf32>
    %74 = vector.extract_strided_slice %10 {offsets = [1, 0], sizes = [4, 256], strides = [1, 1]} : vector<5x256xf32> to vector<4x256xf32>
    %75 = vector.shape_cast %74 : vector<4x256xf32> to vector<4x1x256xf32>
    %76 = vector.broadcast %75 : vector<4x1x256xf32> to vector<4x8x256xf32>
    %77 = arith.mulf %73, %76 : vector<4x8x256xf32>
    %78 = vector.shape_cast %56 : vector<4x8x256xf32> to vector<32x256xf32>
    %79 = arith.truncf %78 : vector<32x256xf32> to vector<32x256xbf16>
    %c0_21 = arith.constant 0 : index
    %c0_22 = arith.constant 0 : index
    %80 = vector.load %arg1[%c0_21, %c0_22] : memref<96x32xbf16, #tpu.memory_space<vmem>>, vector<96x32xbf16>
    %cst_23 = arith.constant dense<0.000000e+00> : vector<96x256xf32>
    %81 = tpu.matmul %80, %79, %cst_23 {dimension_numbers = #tpu.dot_dimension_numbers<[1], [0], [0], [1], [0, 0, 1, 1], [], []>} : vector<96x32xbf16>, vector<32x256xbf16>, vector<96x256xf32> -> vector<96x256xf32>
    %cst_24 = arith.constant 0.000000e+00 : f32
    %82 = vector.broadcast %cst_24 : f32 to vector<3x256xf32>
    %83 = vector.extract_strided_slice %10 {offsets = [0, 0], sizes = [1, 256], strides = [1, 1]} : vector<5x256xf32> to vector<1x256xf32>
    %cst_25 = arith.constant -1.000000e+00 : f32
    %84 = vector.broadcast %cst_25 : f32 to vector<1x256xf32>
    %85 = arith.mulf %84, %83 : vector<1x256xf32>
    %86 = vector.broadcast %85 : vector<1x256xf32> to vector<3x256xf32>
    %87 = arith.addf %82, %86 : vector<3x256xf32>
    %88 = vector.extract_strided_slice %81 {offsets = [0, 0], sizes = [24, 256], strides = [1, 1]} : vector<96x256xf32> to vector<24x256xf32>
    %89 = vector.shape_cast %88 : vector<24x256xf32> to vector<3x8x256xf32>
    %90 = vector.extract_strided_slice %77 {offsets = [0, 0, 0], sizes = [1, 8, 256], strides = [1, 1, 1]} : vector<4x8x256xf32> to vector<1x8x256xf32>
    %91 = vector.shape_cast %90 : vector<1x8x256xf32> to vector<8x256xf32>
    %92 = vector.shape_cast %91 : vector<8x256xf32> to vector<1x8x256xf32>
    %93 = vector.broadcast %92 : vector<1x8x256xf32> to vector<3x8x256xf32>
    %94 = arith.mulf %89, %93 : vector<3x8x256xf32>
    %cst_26 = arith.constant dense<0.000000e+00> : vector<3x256xf32>
    %95 = vector.multi_reduction <add>, %94, %cst_26 [1] : vector<3x8x256xf32> to vector<3x256xf32>
    %96 = arith.addf %87, %95 : vector<3x256xf32>
    %97 = vector.extract_strided_slice %81 {offsets = [24, 0], sizes = [24, 256], strides = [1, 1]} : vector<96x256xf32> to vector<24x256xf32>
    %98 = vector.shape_cast %97 : vector<24x256xf32> to vector<3x8x256xf32>
    %99 = vector.extract_strided_slice %77 {offsets = [1, 0, 0], sizes = [1, 8, 256], strides = [1, 1, 1]} : vector<4x8x256xf32> to vector<1x8x256xf32>
    %100 = vector.shape_cast %99 : vector<1x8x256xf32> to vector<8x256xf32>
    %101 = vector.shape_cast %100 : vector<8x256xf32> to vector<1x8x256xf32>
    %102 = vector.broadcast %101 : vector<1x8x256xf32> to vector<3x8x256xf32>
    %103 = arith.mulf %98, %102 : vector<3x8x256xf32>
    %cst_27 = arith.constant dense<0.000000e+00> : vector<3x256xf32>
    %104 = vector.multi_reduction <add>, %103, %cst_27 [1] : vector<3x8x256xf32> to vector<3x256xf32>
    %105 = arith.addf %96, %104 : vector<3x256xf32>
    %106 = vector.extract_strided_slice %81 {offsets = [48, 0], sizes = [24, 256], strides = [1, 1]} : vector<96x256xf32> to vector<24x256xf32>
    %107 = vector.shape_cast %106 : vector<24x256xf32> to vector<3x8x256xf32>
    %108 = vector.extract_strided_slice %77 {offsets = [2, 0, 0], sizes = [1, 8, 256], strides = [1, 1, 1]} : vector<4x8x256xf32> to vector<1x8x256xf32>
    %109 = vector.shape_cast %108 : vector<1x8x256xf32> to vector<8x256xf32>
    %110 = vector.shape_cast %109 : vector<8x256xf32> to vector<1x8x256xf32>
    %111 = vector.broadcast %110 : vector<1x8x256xf32> to vector<3x8x256xf32>
    %112 = arith.mulf %107, %111 : vector<3x8x256xf32>
    %cst_28 = arith.constant dense<0.000000e+00> : vector<3x256xf32>
    %113 = vector.multi_reduction <add>, %112, %cst_28 [1] : vector<3x8x256xf32> to vector<3x256xf32>
    %114 = arith.addf %105, %113 : vector<3x256xf32>
    %115 = vector.extract_strided_slice %81 {offsets = [72, 0], sizes = [24, 256], strides = [1, 1]} : vector<96x256xf32> to vector<24x256xf32>
    %116 = vector.shape_cast %115 : vector<24x256xf32> to vector<3x8x256xf32>
    %117 = vector.extract_strided_slice %77 {offsets = [3, 0, 0], sizes = [1, 8, 256], strides = [1, 1, 1]} : vector<4x8x256xf32> to vector<1x8x256xf32>
    %118 = vector.shape_cast %117 : vector<1x8x256xf32> to vector<8x256xf32>
    %119 = vector.shape_cast %118 : vector<8x256xf32> to vector<1x8x256xf32>
    %120 = vector.broadcast %119 : vector<1x8x256xf32> to vector<3x8x256xf32>
    %121 = arith.mulf %116, %120 : vector<3x8x256xf32>
    %cst_29 = arith.constant dense<0.000000e+00> : vector<3x256xf32>
    %122 = vector.multi_reduction <add>, %121, %cst_29 [1] : vector<3x8x256xf32> to vector<3x256xf32>
    %123 = arith.addf %114, %122 : vector<3x256xf32>
    %c0_30 = arith.constant 0 : index
    %c0_31 = arith.constant 0 : index
    %124 = vector.load %arg5[%c0_30, %c0_31] : memref<3x256xf32, #tpu.memory_space<vmem>>, vector<3x256xf32>
    tpu.vector_store %arg5[%c0_30, %c0_31], %123 {strides = array<i32>} : memref<3x256xf32, #tpu.memory_space<vmem>>, vector<3x256xf32>,
    return
  }
  func.func @transform_0(%arg0: i32) -> (i32, i32) {
    %c0_i32 = arith.constant 0 : i32
    %c0_i32_0 = arith.constant 0 : i32
    %c0_i32_1 = arith.constant 0 : i32
    return %c0_i32, %c0_i32_0 : i32, i32
  }
  func.func @transform_1(%arg0: i32) -> (i32, i32) {
    %c0_i32 = arith.constant 0 : i32
    %c0_i32_0 = arith.constant 0 : i32
    return %c0_i32, %arg0 : i32, i32
  }
  func.func @transform_2(%arg0: i32) -> (i32, i32) {
    %c0_i32 = arith.constant 0 : i32
    %c0_i32_0 = arith.constant 0 : i32
    return %c0_i32, %arg0 : i32, i32
  }
  func.func @transform_3(%arg0: i32) -> (i32, i32) {
    %c0_i32 = arith.constant 0 : i32
    %c0_i32_0 = arith.constant 0 : i32
    return %c0_i32, %arg0 : i32, i32
  }
  func.func @transform_4(%arg0: i32) -> (i32, i32) {
    %c0_i32 = arith.constant 0 : i32
    %c0_i32_0 = arith.constant 0 : i32
    return %c0_i32, %arg0 : i32, i32
  }
}

</mosaic_0001>

<bundles_post_ra>
// kernel: tpu_custom_call.1
= control target key start
LH: loop header
LB: loop body
LE: loop exit
PB: predicated region body
PF: predicated region fallthrough
CT: control target
= control target key end

     0   :  { %9 = vsyncpa [#allocation3], 0  ;;  %s2034_s0 = inlined_call_operand.vmem [shape: bf16[96,32], index: 0, kind: input, shape index: {}]   ;;  %s2035_s1 = inlined_call_operand.vmem [shape: f32[4,512], index: 1, kind: input, shape index: {}]   ;;  %s2036_s2 = inlined_call_operand.vmem [shape: f32[4,512], index: 2, kind: input, shape index: {}]   ;;  %s2037_s3 = inlined_call_operand.vmem [shape: f32[5,512], index: 3, kind: input, shape index: {}]   ;;  %s2038_s4 = inlined_call_operand.hbm [shape: f32[3,512], index: 4, kind: output, shape index: {}]  }
   0x1   :  { %11 = vsyncpa [#allocation3 + $0x1], 0  ;;  %s1576_s15 = smov 0   ;;  %s1578_s16 = smov 0  }
   0x2   :  { %s1580_s17 = smov 0   ;;  %s1582_s18 = smov 0  }
   0x3 LB: > { %s1597_s19 = sadd.s32 4294967295, %s1546_s18   ;;  %s1390_s20 = sadd.s32 4294967294, %s1546_s18   ;;  %s1546_s18 = sphi %s1582_s18, %s2060_s18   ;;  %s1542_s17 = sphi %s1580_s17, %s2059_s17   ;;  %s1538_s16 = sphi %s1578_s16, %s2058_s16   ;;  %s1534_s15 = sphi %s1576_s15, %s2057_s15  }
   0x4   : > { %s1601_s21 = sadd.s32 1, %s1546_s18   ;;  %s123_s22 = sadd.s32 1, %s1542_s17 }
   0x5   : > { %s120_s23 = ssub.s32 %s1546_s18, %s1601_s21  ;;  %p133_p0 = scmp.ne.s32.totalorder %s1542_s17, %s1538_s16 }
   0x6   : > { %p121_p1 = scmp.eq.s32.totalorder %s120_s23, 0  ;;  %p134_p2 = scmp.eq.s32.totalorder %s1597_s19, 1 }
   0x7   : > { %p139_p3 = scmp.ne.s32.totalorder %s1538_s16, %s1534_s15  ;;  %p140_p4 = scmp.eq.s32.totalorder %s1390_s20, 1 }
   0x8   : > { %s1612_s24 = scalar_select %p121_p1, %s1542_s17, %s123_s22  }
   0x9   : > { %p1614_p5 = por %p134_p2, %p133_p0  ;;  %p1618_p6 = por %p140_p4, %p139_p3 }
   0xa   : > { %p1393_p7 = scmp.ge.s32.totalorder %s1546_s18, 1  ;;  %p188_p8 = scmp.lt.s32.totalorder %s1546_s18, 3 }
   0xc   : > { %p189_p9 = pnand %p1393_p7, %p188_p8 }
   0xd   : > { %s1395_s27 = sshll.u32 (!%p189_p9), %s1597_s19, 1  ;;  %v1548_v0 = vmov (!%p189_p9), 0   ;;  %vm246_vm0 = vcmask (!%p189_p9), 1044480   ;;  %v302_v2 = vlaneseq (!%p189_p9)  ;;  %v1549_v6 = vmov (!%p189_p9), 1966171168   ;;  %s221_s8 = sand.u32 (!%p189_p9), 1, %s1538_s16  }
   0xe   : > { %192 = sbr.rel (%p189_p9) target bundleno = 355 (0x163), region = 36  ;;  %p225_p10 = scmp.lt.s32.totalorder (!%p189_p9), %s1395_s27, 3  ;;  %988 = vmatprep.mubr.bf16.mxu0 (!%p189_p9), %v1548_v0  ;;  %1018 = vmatprep.mubr.bf16.mxu1 (!%p189_p9), %v1548_v0  ;;  %v300_v7 = vunpack.c.l.s4 (!%p189_p9), %v1549_v6 }
   0xf   : > { %v1638_v13 = vshrl.u32 (!%p189_p9), %v302_v2, 7  ;;  %s1420_s10 = sshll.u32 (!%p189_p9), %s1597_s19, 7  ;;  %s1293_s22 = scalar_lea.sflag (!%p189_p9), [#allocation3], %s221_s8 }
  0x10   : > { %v301_v18 = vunpack.c.0.s8 (!%p189_p9), %v300_v7  ;;  %s1990_s20 = scalar_lea.hbm (!%p189_p9), %s2038_s4, %s1420_s10  ;;  %s1550_s19 = smov (!%p189_p9), [#allocation2]  }
  0x11   : > { %v1645_v36 = vsub.s32 (!%p189_p9), 1, %v1638_v13  ;;  %v1648_v37 = vsub.s32 (!%p189_p9), 0, %v1638_v13 }
  0x12   : > { %v1641_v26 = vsub.s32 (!%p189_p9), %v301_v18, %v1638_v13 }
  0x15   : > { %s2062_s27 = smov (!%p225_p10, %s1395_s27), 3 }
  0x16   : > { %s1396_s28 = sshll.u32 %s2062_s27, 2  ;;  %s1400_s29 = sshll.u32 %s2062_s27, 3 }
  0x17   : > { %s234_s6 = scalar_lea.vmem %s2036_s2, %s1396_s28  ;;  %s240_s9 = scalar_lea.vmem %s2037_s3, %s1400_s29 }
  0x18   : > { %v290_v1 = vld [vmem:[%s234_s6] sm:$0xff]  ;;  %v245_v4 = vld [vmem:[%s240_s9 + $0x8] sm:$0x1f]  ;;  %s228_s12 = scalar_lea.vmem %s2035_s1, %s1396_s28  ;;  %s1488_s27 = sshll.u32 %s1550_s19, 4  ;;  %s1489_s27 = int_to_ptr.vmem [resolvable:$false] %s1488_s27 }
  0x19   : > { %v244_v3 = vld [vmem:[%s240_s9] sm:$0x1f]  ;;  %v291_v5 = vadd.f32 1.0, %v290_v1  ;;  %v254_v9 = vsel %vm246_vm0, %v245_v4, -inf  ;;  %s1394_s9 = sshll.u32 %s221_s8, 3  ;;  %s1490_s28 = scalar_lea.vmem %s1489_s27, 256 }
  0x1a   : > { %v247_v8 = vsel %vm246_vm0, %v244_v3, -inf  ;;  %v255_v11 = vrot.slane %v254_v9, 4  ;;  %v285_v16 = vld [vmem:[%s228_s12] sm:$0xff]  ;;  %s223_s11 = scalar_lea.vmem [#allocation2], %s1394_s9 }
  0x1b   : > { %v248_v10 = vrot.slane %v247_v8, 4  ;;  %v292_v12 = vmul.f32 8.0, %v291_v5  ;;  %v286_v22 = vadd.f32 1.0, %v285_v16  ;;  %s1307_s12 = sshll.u32 %s223_s11, 4  ;;  %s1992_s12 = int_to_ptr.vmem [resolvable:$true] %s1307_s12 }
  0x1c   : > { %v256_v15 = vmax.f32 %v254_v9, %v255_v11  ;;  %s1484_s23 = scalar_lea.vmem %s1992_s12, 128  ;;  %p1491_p0 = scmp.lt.s32.totalorder %s1992_s12, %s1489_s27 }
  0x1d   : > { %v249_v14 = vmax.f32 %v247_v8, %v248_v10  ;;  %v1402_v17 = vadd.f32 -1.0, %v292_v12  ;;  %v287_v31 = vmul.f32 8.0, %v286_v22  ;;  %p1485_p11 = scmp.ne.s32.totalorder %s1992_s12, %s1484_s23  ;;  %p1492_p1 = scmp.lt.s32.totalorder %s1490_s28, %s1484_s23 }
  0x1e   : > { %v257_v20 = vrot.slane %v256_v15, 2 }
  0x1f   : > { %v250_v19 = vrot.slane %v249_v14, 2  ;;  %v294_v21 = vmul.f32 0.5, %v1402_v17  ;;  %v1401_v43 = vadd.f32 -1.0, %v287_v31  ;;  %p1486_p12 = pnand %p1485_p11, %p1614_p5  ;;  %p1493_p2 = por %p1492_p1, %p1491_p0 }
  0x20   : > { %v258_v24 = vmax.f32 %v256_v15, %v257_v20 }
  0x21   : > { %v251_v23 = vmax.f32 %v249_v14, %v250_v19  ;;  %v296_v25 = vfloor.f32 %v294_v21  ;;  %p1487_p13 = pneg %p1486_p12 }
  0x22   : > { %v259_v28 = vrot.slane %v258_v24, 1 }
  0x23   : > { %v252_v27 = vrot.slane %v251_v23, 1  ;;  %v327_v29 = vsub.f32 %v294_v21, %v296_v25  ;;  %v1427_v30 = vtrunc.f32 %v296_v25  ;;  %p1494_p3 = pnand %p1493_p2, %p1487_p13 }
  0x24   : > { %v260_v33 = vmax.f32 %v258_v24, %v259_v28 }
  0x25   : > { %v253_v32 = vmax.f32 %v251_v23, %v252_v27  ;;  %v335_v34 = vrot.slane %v327_v29, %v1641_v26  ;;  %v1428_v35 = vcvt.f32.s32 %v1427_v30  ;;  %v1705_v29 = vmul.f32 0.5, %v1401_v43 }
  0x26   : > { %v262_v39 = vsub.f32 %v245_v4, %v260_v33 }
  0x27   : > { %v261_v38 = vsub.f32 %v244_v3, %v253_v32  ;;  %v336_v40 = vcombine.high %v335_v34, %v335_v34  ;;  %v343_v41 = vrot.slane %v335_v34, %v1641_v26  ;;  %v389_v42 = vrot.slane %v1428_v35, %v1641_v26 }
  0x28   : > { %v265_v45 = vmul.f32 1.442695, %v262_v39 }
  0x29   : > { %v263_v44 = vmul.f32 1.442695, %v261_v38  ;;  %v350_v46 = vrot.slane %v336_v40, %v1641_v26  ;;  %v449_v47 = vsub.f32 1.0, %v343_v41  ;;  %v390_v48 = vcombine.high %v389_v42, %v389_v42 }
  0x2a   : > { %v397_v49 = vrot.slane %v389_v42, %v1641_v26  ;;  %v556_v50 = vrot.slane %v343_v41, %v1645_v36  ;;  %v552_v51 = vrot.slane %v343_v41, %v1648_v37  ;;  %v351_v22 = vcombine.high %v343_v41, %v343_v41 }
  0x2b   : > { %1476 = vpow2.f32 %v263_v44  ;;  %v450_v52 = vsub.f32 1.0, %v350_v46  ;;  %v464_v53 = vrot.slane %v449_v47, %v1645_v36  ;;  %v564_v54 = vrot.slane %v350_v46, %v1645_v36 }
  0x2c   : > { %1478 = vpow2.f32 %v265_v45  ;;  %v404_v55 = vrot.slane %v390_v48, %v1641_v26  ;;  %v416_v56 = vrot.slane %v397_v49, %v1645_v36  ;;  %v505_v57 = vadd.s32 1, %v397_v49  ;;  %v1474_v45 = vld [vmem:[%s2034_s0 + $0x10] sm:$0xff]  }
  0x2d   : > { %v472_v58 = vrot.slane %v450_v52, %v1645_v36  ;;  %v412_v59 = vrot.slane %v397_v49, %v1648_v37  ;;  %v460_v60 = vrot.slane %v449_v47, %v1648_v37  ;;  %v468_v61 = vrot.slane %v450_v52, %v1648_v37 }
  0x2e   : > { %v424_v62 = vrot.slane %v404_v55, %v1645_v36  ;;  %vm1666_vm1 = vcmp.eq.s32.totalorder %v1638_v13, %v416_v56  ;;  %v506_v1 = vadd.s32 1, %v404_v55  ;;  %v516_v2 = vrot.slane %v505_v57, %v1645_v36 }
  0x2f   : > { %v498_v3 = vsel %vm1666_vm1, %v464_v53, 0.0  ;;  %v420_v4 = vrot.slane %v404_v55, %v1648_v37  ;;  %vm1675_vm2 = vcmp.eq.s32.totalorder %v1638_v13, %v412_v59  ;;  %v512_v6 = vrot.slane %v505_v57, %v1648_v37 }
  0x30   : > { %vm1681_vm3 = vcmp.eq.s32.totalorder %v1638_v13, %v424_v62  ;;  %v524_v8 = vrot.slane %v506_v1, %v1645_v36  ;;  %vm542_vm4 = vcmp.eq.s32.totalorder %v1638_v13, %v516_v2  ;;  %v497_v9 = vsel %vm1675_vm2, %v460_v60, 0.0 }
  0x31   : > { %v500_v10 = vsel %vm1681_vm3, %v472_v58, 0.0  ;;  %v590_v11 = vsel %vm542_vm4, %v556_v50, 0.0  ;;  %vm1692_vm5 = vcmp.eq.s32.totalorder %v1638_v13, %v420_v4  ;;  %v520_v14 = vrot.slane %v506_v1, %v1648_v37 }
  0x32   : > { %vm544_vm6 = vcmp.eq.s32.totalorder %v1638_v13, %v524_v8  ;;  %v598_v15 = vadd.f32 %v590_v11, %v498_v3  ;;  %v499_v16 = vsel %vm1692_vm5, %v468_v61, 0.0  ;;  %vm541_vm7 = vcmp.eq.s32.totalorder %v1638_v13, %v512_v6 }
  0x33   : > { %v592_v17 = vsel %vm544_vm6, %v564_v54, 0.0  ;;  %vm543_vm8 = vcmp.eq.s32.totalorder %v1638_v13, %v520_v14  ;;  %v560_v18 = vrot.slane %v350_v46, %v1648_v37  ;;  %v589_v19 = vsel %vm541_vm7, %v552_v51, 0.0 }
  0x34   : > { %v600_v20 = vadd.f32 %v592_v17, %v500_v10  ;;  %v597_v21 = vadd.f32 %v589_v19, %v497_v9  ;;  %v352_v23 = vcombine.high %v350_v46, %v350_v46  ;;  %v405_v27 = vcombine.high %v397_v49, %v397_v49  ;;  %v1475_v46 = vld [vmem:[%s2034_s0 + $0x28] sm:$0xff]  }
  0x35   : > { %v1703_v24 = vpop.eup %1476  ;;  %v591_v25 = vsel %vm543_vm8, %v560_v18, 0.0  ;;  %v406_v28 = vcombine.high %v404_v55, %v404_v55  ;;  %v451_v33 = vsub.f32 1.0, %v351_v22  ;;  %v572_v51 = vrot.slane %v351_v22, %v1645_v36 }
  0x36   : > { %v1707_v30 = vpop.eup %1478  ;;  %v892_v31 = vpack.c.bf16 %v600_v20, %v598_v15  ;;  %v599_v32 = vadd.f32 %v591_v25, %v499_v16  ;;  %v452_v34 = vsub.f32 1.0, %v352_v23  ;;  %v432_v35 = vrot.slane %v405_v27, %v1645_v36 }
  0x37   : > { %v440_v38 = vrot.slane %v406_v28, %v1645_v36  ;;  %v507_v39 = vadd.s32 1, %v405_v27  ;;  %v508_v40 = vadd.s32 1, %v406_v28  ;;  %v480_v42 = vrot.slane %v451_v33, %v1645_v36 }
  0x38   : > { %956 = vmatprep.subr.bf16.mxu0 %v892_v31  ;;  %1421 = vmatprep.subr.bf16.mxu1 %v892_v31  ;;  %v891_v41 = vpack.c.bf16 %v599_v32, %v597_v21  ;;  %v488_v43 = vrot.slane %v452_v34, %v1645_v36  ;;  %v267_v44 = vsel %vm246_vm0, %v1703_v24, 0.0  ;;  %vm1716_vm9 = vcmp.eq.s32.totalorder %v1638_v13, %v432_v35  ;;  %v1470_v21 = vld [vmem:[%s2034_s0] sm:$0xff]  }
  0x39   : > { %vm1721_vm10 = vcmp.eq.s32.totalorder %v1638_v13, %v440_v38  ;;  %v532_v47 = vrot.slane %v507_v39, %v1645_v36  ;;  %v540_v48 = vrot.slane %v508_v40, %v1645_v36  ;;  %v502_v49 = vsel %vm1716_vm9, %v480_v42, 0.0 }
  0x3a   : > { %957 = vmatpush1.bf16.msra.mxu0 %v891_v41  ;;  %1423 = vmatpush1.bf16.msra.mxu1 %v891_v41  ;;  %v504_v50 = vsel %vm1721_vm10, %v488_v43, 0.0  ;;  %v580_v52 = vrot.slane %v352_v23, %v1645_v36  ;;  %v428_v53 = vrot.slane %v405_v27, %v1648_v37  ;;  %v436_v54 = vrot.slane %v406_v28, %v1648_v37 }
  0x3b   : > { %vm546_vm11 = vcmp.eq.s32.totalorder %v1638_v13, %v532_v47  ;;  %vm548_vm12 = vcmp.eq.s32.totalorder %v1638_v13, %v540_v48  ;;  %v476_v57 = vrot.slane %v451_v33, %v1648_v37  ;;  %v484_v58 = vrot.slane %v452_v34, %v1648_v37 }
  0x3c   : > { %v594_v55 = vsel %vm546_vm11, %v572_v51, 0.0  ;;  %v596_v56 = vsel %vm548_vm12, %v580_v52, 0.0  ;;  %vm1740_vm13 = vcmp.eq.s32.totalorder %v1638_v13, %v428_v53  ;;  %vm1745_vm14 = vcmp.eq.s32.totalorder %v1638_v13, %v436_v54 }
  0x3d   : > { %v602_v59 = vadd.f32 %v594_v55, %v502_v49  ;;  %v604_v60 = vadd.f32 %v596_v56, %v504_v50  ;;  %v501_v63 = vsel %vm1740_vm13, %v476_v57, 0.0  ;;  %v503_v1 = vsel %vm1745_vm14, %v484_v58, 0.0 }
  0x3e   : > { %v528_v2 = vrot.slane %v507_v39, %v1648_v37  ;;  %v536_v3 = vrot.slane %v508_v40, %v1648_v37  ;;  %v568_v5 = vrot.slane %v351_v22, %v1648_v37  ;;  %v576_v6 = vrot.slane %v352_v23, %v1648_v37  ;;  %v1471_v22 = vld [vmem:[%s2034_s0 + $0x18] sm:$0xff]   ;;  %v1472_v39 = vld [vmem:[%s2034_s0 + $0x8] sm:$0xff]   ;;  %v1473_v40 = vld [vmem:[%s2034_s0 + $0x20] sm:$0xff]  }
  0x3f   : > { %v894_v4 = vpack.c.bf16 %v604_v60, %v602_v59  ;;  %v268_v7 = vrot.slane %v267_v44, 4  ;;  %v274_v8 = vsel %vm246_vm0, %v1707_v30, 0.0  ;;  %v295_v9 = vfloor.f32 %v1705_v29 }
  0x40   : > { %vm545_vm15 = vcmp.eq.s32.totalorder %v1638_v13, %v528_v2  ;;  %vm547_vm1 = vcmp.eq.s32.totalorder %v1638_v13, %v536_v3  ;;  %v275_v14 = vrot.slane %v274_v8, 4  ;;  %vm937_vm0 = vcmask 261120  }
  0x41   : > { %958 = vmatprep.subr.bf16.mxu0 %v894_v4  ;;  %1422 = vmatprep.subr.bf16.mxu1 %v894_v4  ;;  %v593_v10 = vsel %vm545_vm15, %v568_v5, 0.0  ;;  %v595_v11 = vsel %vm547_vm1, %v576_v6, 0.0  ;;  %v269_v12 = vadd.f32 %v268_v7, %v267_v44  ;;  %v1425_v20 = vtrunc.f32 %v295_v9 }
  0x42   : > { %v601_v15 = vadd.f32 %v593_v10, %v501_v63  ;;  %v603_v16 = vadd.f32 %v595_v11, %v503_v1  ;;  %v276_v18 = vadd.f32 %v275_v14, %v274_v8  ;;  %v297_v35 = vsub.f32 %v1705_v29, %v295_v9 }
  0x43   : > { %v270_v17 = vrot.slane %v269_v12, 2  ;;  %v1426_v31 = vcvt.f32.s32 %v1425_v20 }
  0x44   : > { %v893_v19 = vpack.c.bf16 %v603_v16, %v601_v15  ;;  %v277_v25 = vrot.slane %v276_v18, 2  ;;  %v1783_v41 = vrot.slane %v297_v35, %v1641_v26 }
  0x45   : > { %v271_v23 = vadd.f32 %v270_v17, %v269_v12  ;;  %v1774_v38 = vrot.slane %v1426_v31, %v1641_v26 }
  0x46   : > { %959 = vmatpush1.bf16.msra.mxu0 %v893_v19  ;;  %1424 = vmatpush1.bf16.msra.mxu1 %v893_v19  ;;  %v278_v28 = vadd.f32 %v277_v25, %v276_v18  ;;  %v313_v43 = vrot.slane %v1783_v41, %v1641_v26  ;;  %v306_v35 = vcombine.high %v1783_v41, %v1783_v41 }
  0x47   : > { %v272_v27 = vrot.slane %v271_v23, 1  ;;  %v372_v42 = vrot.slane %v1774_v38, %v1641_v26 }
  0x48   : > { %v279_v33 = vrot.slane %v278_v28, 1  ;;  %v645_v47 = vsub.f32 1.0, %v313_v43  ;;  %v748_v53 = vrot.slane %v313_v43, %v1648_v37  ;;  %v321_v62 = vcombine.high %v313_v43, %v313_v43 }
  0x49   : > { %1409 = vmatmul.mubr.msk.bf16.vlgmr.msra.gmra.mrb[0].mxu0 %vm937_vm0, %v1470_v21  ;;  %1412 = vmatmul.mubr.msk.bf16.vlgmr.msra.gmra.mrb[0].mxu1 %vm937_vm0, %v1471_v22  ;;  %v273_v32 = vadd.f32 %v272_v27, %v271_v23  ;;  %v701_v29 = vadd.s32 1, %v372_v42  ;;  %v608_v49 = vrot.slane %v372_v42, %v1648_v37  ;;  %v380_v61 = vcombine.high %v372_v42, %v372_v42 }
  0x4a   : > { %998 = vmatprep.mubr.bf16.mxu0 %v1548_v0  ;;  %1028 = vmatprep.mubr.bf16.mxu1 %v1548_v0  ;;  %v280_v34 = vadd.f32 %v279_v33, %v278_v28  ;;  %v656_v52 = vrot.slane %v645_v47, %v1648_v37  ;;  %v647_v1 = vsub.f32 1.0, %v321_v62  ;;  %v764_v5 = vrot.slane %v321_v62, %v1648_v37 }
  0x4b   : > { %1480 = vrcp.f32 %v273_v32  ;;  %vm637_vm2 = vcmp.eq.s32.totalorder %v1638_v13, %v608_v49  ;;  %v703_v63 = vadd.s32 1, %v380_v61  ;;  %v624_v2 = vrot.slane %v380_v61, %v1648_v37 }
  0x4c   : > { %1482 = vrcp.f32 %v280_v34  ;;  %v693_v55 = vsel %vm637_vm2, %v656_v52, 0.0  ;;  %v672_v4 = vrot.slane %v647_v1, %v1648_v37  ;;  %v612_v6 = vrot.slane %v372_v42, %v1645_v36 }
  0x4d   : > { %v724_v3 = vrot.slane %v703_v63, %v1648_v37  ;;  %v712_v7 = vrot.slane %v701_v29, %v1645_v36  ;;  %vm641_vm4 = vcmp.eq.s32.totalorder %v1638_v13, %v624_v2  ;;  %v660_v9 = vrot.slane %v645_v47, %v1645_v36 }
  0x4e   : > { %v697_v10 = vsel %vm641_vm4, %v672_v4, 0.0  ;;  %vm638_vm6 = vcmp.eq.s32.totalorder %v1638_v13, %v612_v6  ;;  %v752_v16 = vrot.slane %v313_v43, %v1645_v36  ;;  %v628_v18 = vrot.slane %v380_v61, %v1645_v36 }
  0x4f   : > { %vm741_vm5 = vcmp.eq.s32.totalorder %v1638_v13, %v724_v3  ;;  %vm738_vm7 = vcmp.eq.s32.totalorder %v1638_v13, %v712_v7  ;;  %v694_v15 = vsel %vm638_vm6, %v660_v9, 0.0  ;;  %v676_v19 = vrot.slane %v647_v1, %v1645_v36 }
  0x50   : > { %v789_v11 = vsel %vm741_vm5, %v764_v5, 0.0  ;;  %v728_v20 = vrot.slane %v703_v63, %v1645_v36  ;;  %v786_v22 = vsel %vm738_vm7, %v752_v16, 0.0  ;;  %v768_v23 = vrot.slane %v321_v62, %v1645_v36 }
  0x51   : > { %1410 = vmatmul.mubr.msk.bf16.gmra.mrb[4].mxu0 %vm937_vm0, %v1472_v39  ;;  %1413 = vmatmul.mubr.msk.bf16.gmra.mrb[4].mxu1 %vm937_vm0, %v1473_v40  ;;  %v797_v12 = vadd.f32 %v789_v11, %v697_v10  ;;  %v794_v25 = vadd.f32 %v786_v22, %v694_v15  ;;  %vm642_vm8 = vcmp.eq.s32.totalorder %v1638_v13, %v628_v18  ;;  %vm1109_vm2 = vcmask 1041409  }
  0x52   : > { %1008 = vmatprep.mubr.bf16.mxu0 %v1548_v0  ;;  %1038 = vmatprep.mubr.bf16.mxu1 %v1548_v0  ;;  %v708_v0 = vrot.slane %v701_v29, %v1648_v37  ;;  %vm742_vm9 = vcmp.eq.s32.totalorder %v1638_v13, %v728_v20  ;;  %v698_v28 = vsel %vm642_vm8, %v676_v19, 0.0  ;;  %v365_v32 = vcombine.high %v1774_v38, %v1774_v38 }
  0x53   : > { %v790_v31 = vsel %vm742_vm9, %v768_v23, 0.0  ;;  %v320_v42 = vrot.slane %v306_v35, %v1641_v26 }
  0x54   : > { %vm737_vm3 = vcmp.eq.s32.totalorder %v1638_v13, %v708_v0  ;;  %v798_v34 = vadd.f32 %v790_v31, %v698_v28  ;;  %v379_v39 = vrot.slane %v365_v32, %v1641_v26 }
  0x55   : > { %v1481_v44 = vpop.eup %1480  ;;  %v756_v41 = vrot.slane %v320_v42, %v1648_v37 }
  0x56   : > { %v1800_v48 = vmul.f32 %v1481_v44, %v1703_v24  ;;  %v1483_v50 = vpop.eup %1482  ;;  %v702_v29 = vadd.s32 1, %v379_v39  ;;  %v381_v43 = vcombine.high %v379_v39, %v379_v39  ;;  %v646_v44 = vsub.f32 1.0, %v320_v42 }
  0x57   : > { %v1805_v51 = vmul.f32 %v1483_v50, %v1707_v30  ;;  %v785_v30 = vsel %vm737_vm3, %v748_v53, 0.0  ;;  %v620_v63 = vrot.slane %v379_v39, %v1645_v36  ;;  %vm1111_vm3 = vcmask 1042434  }
  0x58   : > { %v793_v57 = vadd.f32 %v785_v30, %v693_v55  ;;  %v716_v38 = vrot.slane %v702_v29, %v1648_v37  ;;  %v704_v49 = vadd.s32 1, %v381_v43  ;;  %v664_v0 = vrot.slane %v646_v44, %v1648_v37 }
  0x59   : > { %1411 = vmatmul.mubr.msk.bf16.gmra.mrb[8].mxu0 %vm937_vm0, %v1474_v45  ;;  %1414 = vmatmul.mubr.msk.bf16.gmra.mrb[8].mxu1 %vm937_vm0, %v1475_v46  ;;  %v803_v24 = vcombine.low %v1800_v48, %v1805_v51  ;;  %v322_v45 = vcombine.high %v320_v42, %v320_v42  ;;  %v616_v46 = vrot.slane %v379_v39, %v1648_v37  ;;  %v1898_v28 = vmul.f32 -1.0, %v1805_v51 }
  0x5a   : > { %v804_v52 = vcombine.high %v1800_v48, %v1805_v51  ;;  %vm739_vm11 = vcmp.eq.s32.totalorder %v1638_v13, %v716_v38  ;;  %v668_v3 = vrot.slane %v646_v44, %v1645_v36  ;;  %vm640_vm14 = vcmp.eq.s32.totalorder %v1638_v13, %v620_v63 }
  0x5b   : > { %v811_v54 = vrot.slane %v803_v24, %v1641_v26  ;;  %v648_v50 = vsub.f32 1.0, %v322_v45  ;;  %vm639_vm10 = vcmp.eq.s32.totalorder %v1638_v13, %v616_v46  ;;  %v632_v24 = vrot.slane %v381_v43, %v1648_v37 }
  0x5c   : > { %v695_v55 = vsel %vm639_vm10, %v664_v0, 0.0  ;;  %v787_v30 = vsel %vm739_vm11, %v756_v41, 0.0  ;;  %v818_v62 = vrot.slane %v804_v52, %v1641_v26  ;;  %v720_v6 = vrot.slane %v702_v29, %v1645_v36 }
  0x5d   : > { %v819_v56 = vcombine.high %v811_v54, %v811_v54  ;;  %v826_v47 = vrot.slane %v811_v54, %v1641_v26  ;;  %v680_v54 = vrot.slane %v648_v50, %v1648_v37  ;;  %vm643_vm12 = vcmp.eq.s32.totalorder %v1638_v13, %v632_v24 }
  0x5e   : > { %v833_v5 = vrot.slane %v818_v62, %v1641_v26  ;;  %v696_v7 = vsel %vm640_vm14, %v668_v3, 0.0  ;;  %v636_v9 = vrot.slane %v381_v43, %v1645_v36  ;;  %vm740_vm15 = vcmp.eq.s32.totalorder %v1638_v13, %v720_v6 }
  0x5f   : > { %v840_v58 = vrot.slane %v819_v56, %v1641_v26  ;;  %v841_v53 = vcombine.high %v826_v47, %v826_v47  ;;  %v732_v56 = vrot.slane %v704_v49, %v1648_v37  ;;  %v699_v61 = vsel %vm643_vm12, %v680_v54, 0.0 }
  0x60   : > { %v870_v10 = vrot.slane %v833_v5, %v1648_v37  ;;  %vm644_vm1 = vcmp.eq.s32.totalorder %v1638_v13, %v636_v9  ;;  %v736_v26 = vrot.slane %v704_v49, %v1645_v36  ;;  %v776_v15 = vrot.slane %v322_v45, %v1645_v36 }
  0x61   : > { %v846_v59 = vrot.slane %v840_v58, %v1648_v37  ;;  %v842_v8 = vcombine.high %v840_v58, %v840_v58  ;;  %v850_v17 = vrot.slane %v840_v58, %v1645_v36  ;;  %v854_v58 = vrot.slane %v841_v53, %v1648_v37 }
  0x62   : > { %vm743_vm13 = vcmp.eq.s32.totalorder %v1638_v13, %v732_v56  ;;  %v858_v11 = vrot.slane %v841_v53, %v1645_v36  ;;  %vm744_vm0 = vcmp.eq.s32.totalorder %v1638_v13, %v736_v26  ;;  %v874_v19 = vrot.slane %v833_v5, %v1645_v36 }
  0x63   : > { %v1818_v60 = vmul.f32 %v846_v59, %v793_v57  ;;  %v862_v14 = vrot.slane %v842_v8, %v1648_v37  ;;  %v866_v27 = vrot.slane %v842_v8, %v1645_v36  ;;  %v1845_v33 = vmul.f32 %v850_v17, %v794_v25 }
  0x64   : > { %v795_v57 = vadd.f32 %v787_v30, %v695_v55  ;;  %v772_v59 = vrot.slane %v322_v45, %v1648_v37  ;;  %v760_v8 = vrot.slane %v320_v42, %v1645_v36  ;;  %v792_v22 = vsel %vm744_vm0, %v776_v15, 0.0 }
  0x65   : > { %v1837_v21 = vmul.f32 %v862_v14, %v797_v12  ;;  %v1850_v40 = vmul.f32 %v866_v27, %v798_v34  ;;  %v684_v12 = vrot.slane %v648_v50, %v1645_v36  ;;  %v1895_v27 = vmul.f32 -1.0, %v1800_v48 }
  0x66   : > { %v1871_v1 = vmul.f32 %v854_v58, %v795_v57  ;;  %v791_v2 = vsel %vm743_vm13, %v772_v59, 0.0  ;;  %v788_v14 = vsel %vm740_vm15, %v760_v8, 0.0  ;;  %v1058_v51 = vrot.slane %v1898_v28, %v1648_v37 }
  0x67   : > { %v799_v4 = vadd.f32 %v791_v2, %v699_v61  ;;  %v796_v17 = vadd.f32 %v788_v14, %v696_v7  ;;  %v700_v18 = vsel %vm644_vm1, %v684_v12, 0.0  ;;  %v1054_v48 = vrot.slane %v1895_v27, %v1648_v37 }
  0x68   : > { %v800_v23 = vadd.f32 %v792_v22, %v700_v18 }
  0x69   : > { %v1886_v16 = vmul.f32 %v870_v10, %v799_v4  ;;  %v1890_v20 = vmul.f32 %v858_v11, %v796_v17 }
  0x6a   : > { %v1892_v25 = vmul.f32 %v874_v19, %v800_v23 }
 0x11c   : > { %v990_v31 = vpop.f32.mrb[0].mxu0  ;;  %v1020_v32 = vpop.f32.mrb[0].mxu1 }
 0x11d   : > { %v1061_v34 = vmul.f32 %v990_v31, %v1818_v60  ;;  %v1175_v13 = vmul.f32 %v1020_v32, %v1837_v21  ;;  %v992_v35 = vpop.f32.mrb[1].mxu0  ;;  %v1022_v36 = vpop.f32.mrb[1].mxu1 }
 0x11e   : > { %v1062_v39 = vmul.f32 %v992_v35, %v1845_v33  ;;  %v1176_v42 = vmul.f32 %v1022_v36, %v1850_v40  ;;  %v994_v29 = vpop.f32.mrb[2].mxu0  ;;  %v1024_v43 = vpop.f32.mrb[2].mxu1 }
 0x11f   : > { %v1067_v44 = vrot.slane %v1061_v34, 4  ;;  %v1181_v45 = vrot.slane %v1175_v13, 4  ;;  %v1063_v46 = vmul.f32 %v994_v29, %v1818_v60  ;;  %v1177_v38 = vmul.f32 %v1024_v43, %v1837_v21  ;;  %v996_v47 = vpop.f32.mrb[3].mxu0  ;;  %v1026_v49 = vpop.f32.mrb[3].mxu1 }
 0x120   : > { %v1073_v0 = vrot.slane %v1062_v39, 4  ;;  %v1187_v41 = vrot.slane %v1176_v42, 4  ;;  %v1064_v50 = vmul.f32 %v996_v47, %v1845_v33  ;;  %v1178_v52 = vmul.f32 %v1026_v49, %v1850_v40 }
 0x121   : > { %v1068_v53 = vadd.f32 %v1067_v44, %v1061_v34  ;;  %v1182_v24 = vadd.f32 %v1181_v45, %v1175_v13  ;;  %v1079_v55 = vrot.slane %v1063_v46, 4  ;;  %v1193_v30 = vrot.slane %v1177_v38, 4 }
 0x122   : > { %v1074_v54 = vadd.f32 %v1073_v0, %v1062_v39  ;;  %v1188_v56 = vadd.f32 %v1187_v41, %v1176_v42  ;;  %v1085_v57 = vrot.slane %v1064_v50, 4  ;;  %v1199_v58 = vrot.slane %v1178_v52, 4 }
 0x123   : > { %v1069_v59 = vrot.slane %v1068_v53, 2  ;;  %v1183_v61 = vrot.slane %v1182_v24, 2  ;;  %v1080_v62 = vadd.f32 %v1079_v55, %v1063_v46  ;;  %v1194_v63 = vadd.f32 %v1193_v30, %v1177_v38 }
 0x124   : > { %v1075_v2 = vrot.slane %v1074_v54, 2  ;;  %v1189_v3 = vrot.slane %v1188_v56, 2  ;;  %v1086_v4 = vadd.f32 %v1085_v57, %v1064_v50  ;;  %v1200_v5 = vadd.f32 %v1199_v58, %v1178_v52  ;;  %v1000_v6 = vpop.f32.mrb[4].mxu0  ;;  %v1030_v7 = vpop.f32.mrb[4].mxu1 }
 0x125   : > { %v1070_v8 = vadd.f32 %v1069_v59, %v1068_v53  ;;  %v1184_v9 = vadd.f32 %v1183_v61, %v1182_v24  ;;  %v1081_v10 = vrot.slane %v1080_v62, 2  ;;  %v1195_v11 = vrot.slane %v1194_v63, 2  ;;  %v1002_v12 = vpop.f32.mrb[5].mxu0  ;;  %v1032_v14 = vpop.f32.mrb[5].mxu1 }
 0x126   : > { %v1076_v26 = vadd.f32 %v1075_v2, %v1074_v54  ;;  %v1190_v15 = vadd.f32 %v1189_v3, %v1188_v56  ;;  %v1087_v17 = vrot.slane %v1086_v4, 2  ;;  %v1201_v18 = vrot.slane %v1200_v5, 2  ;;  %v1004_v19 = vpop.f32.mrb[6].mxu0  ;;  %v1034_v22 = vpop.f32.mrb[6].mxu1 }
 0x127   : > { %v1071_v23 = vrot.slane %v1070_v8, 1  ;;  %v1185_v31 = vrot.slane %v1184_v9, 1  ;;  %v1082_v32 = vadd.f32 %v1081_v10, %v1080_v62  ;;  %v1196_v34 = vadd.f32 %v1195_v11, %v1194_v63  ;;  %v1006_v13 = vpop.f32.mrb[7].mxu0  ;;  %v1036_v35 = vpop.f32.mrb[7].mxu1 }
 0x128   : > { %v1077_v36 = vrot.slane %v1076_v26, 1  ;;  %v1191_v39 = vrot.slane %v1190_v15, 1  ;;  %v1088_v42 = vadd.f32 %v1087_v17, %v1086_v4  ;;  %v1202_v29 = vadd.f32 %v1201_v18, %v1200_v5 }
 0x129   : > { %v1072_v43 = vadd.f32 %v1071_v23, %v1070_v8  ;;  %v1186_v44 = vadd.f32 %v1185_v31, %v1184_v9  ;;  %v1083_v45 = vrot.slane %v1082_v32, 1  ;;  %v1197_v46 = vrot.slane %v1196_v34, 1 }
 0x12a   : > { %v1078_v38 = vadd.f32 %v1077_v36, %v1076_v26  ;;  %v1192_v47 = vadd.f32 %v1191_v39, %v1190_v15  ;;  %v1089_v49 = vrot.slane %v1088_v42, 1  ;;  %v1203_v0 = vrot.slane %v1202_v29, 1 }
 0x12b   : > { %v1084_v41 = vadd.f32 %v1083_v45, %v1082_v32  ;;  %v1198_v50 = vadd.f32 %v1197_v46, %v1196_v34  ;;  %v1065_v52 = vmul.f32 %v1000_v6, %v1818_v60  ;;  %v1179_v53 = vmul.f32 %v1030_v7, %v1837_v21 }
 0x12c   : > { %v1090_v24 = vadd.f32 %v1089_v49, %v1088_v42  ;;  %v1204_v55 = vadd.f32 %v1203_v0, %v1202_v29  ;;  %v1066_v30 = vmul.f32 %v1002_v12, %v1845_v33  ;;  %v1180_v54 = vmul.f32 %v1032_v14, %v1850_v40  ;;  %v1010_v56 = vpop.f32.mrb[8].mxu0  ;;  %v1916_v57 = vpop.f32.mrb[8].mxu1 }
 0x12d   : > { %v1110_v58 = vsel %vm1109_vm2, %v1084_v41, %v1072_v43  ;;  %v1920_v59 = vsel %vm1109_vm2, %v1198_v50, %v1186_v44  ;;  %v1091_v61 = vrot.slane %v1065_v52, 4  ;;  %v1205_v62 = vrot.slane %v1179_v53, 4  ;;  %v1922_v63 = vpop.f32.mrb[9].mxu0  ;;  %v1924_v60 = vpop.f32.mrb[9].mxu1 }
 0x12e   : > { %v1113_v21 = vsel %vm1109_vm2, %v1090_v24, %v1078_v38  ;;  %v1928_v33 = vsel %vm1109_vm2, %v1204_v55, %v1192_v47  ;;  %v1097_v40 = vrot.slane %v1066_v30, 4  ;;  %v1211_v2 = vrot.slane %v1180_v54, 4  ;;  %v1014_v3 = vpop.f32.mrb[10].mxu0  ;;  %v1044_v4 = vpop.f32.mrb[10].mxu1 }
 0x12f   : > { %v1092_v5 = vadd.f32 %v1091_v61, %v1065_v52  ;;  %v1206_v6 = vadd.f32 %v1205_v62, %v1179_v53  ;;  %v1119_v7 = vmul.f32 %v1004_v19, %v1871_v1  ;;  %v1231_v8 = vmul.f32 %v1034_v22, %v1886_v16  ;;  %v1016_v9 = vpop.f32.mrb[11].mxu0  ;;  %v1046_v10 = vpop.f32.mrb[11].mxu1 }
 0x130   : > { %v1098_v11 = vadd.f32 %v1097_v40, %v1066_v30  ;;  %v1212_v12 = vadd.f32 %v1211_v2, %v1180_v54  ;;  %v1120_v14 = vmul.f32 %v1006_v13, %v1890_v20  ;;  %v1232_v26 = vmul.f32 %v1036_v35, %v1892_v25 }
 0x131   : > { %v1093_v15 = vrot.slane %v1092_v5, 2  ;;  %v1207_v17 = vrot.slane %v1206_v6, 2  ;;  %v1125_v18 = vrot.slane %v1119_v7, 4  ;;  %v1237_v23 = vrot.slane %v1231_v8, 4 }
 0x132   : > { %v1099_v31 = vrot.slane %v1098_v11, 2  ;;  %v1213_v32 = vrot.slane %v1212_v12, 2  ;;  %v1131_v34 = vrot.slane %v1120_v14, 4  ;;  %v1243_v36 = vrot.slane %v1232_v26, 4 }
 0x133   : > { %v1094_v39 = vadd.f32 %v1093_v15, %v1092_v5  ;;  %v1208_v19 = vadd.f32 %v1207_v17, %v1206_v6  ;;  %v1126_v42 = vadd.f32 %v1125_v18, %v1119_v7  ;;  %v1238_v22 = vadd.f32 %v1237_v23, %v1231_v8 }
 0x134   : > { %v1100_v29 = vadd.f32 %v1099_v31, %v1098_v11  ;;  %v1214_v43 = vadd.f32 %v1213_v32, %v1212_v12  ;;  %v1132_v44 = vadd.f32 %v1131_v34, %v1120_v14  ;;  %v1244_v45 = vadd.f32 %v1243_v36, %v1232_v26 }
 0x135   : > { %v1095_v46 = vrot.slane %v1094_v39, 1  ;;  %v1209_v13 = vrot.slane %v1208_v19, 1  ;;  %v1127_v38 = vrot.slane %v1126_v42, 2  ;;  %v1239_v35 = vrot.slane %v1238_v22, 2 }
 0x136   : > { %v1101_v47 = vrot.slane %v1100_v29, 1  ;;  %v1215_v49 = vrot.slane %v1214_v43, 1  ;;  %v1133_v0 = vrot.slane %v1132_v44, 2  ;;  %v1245_v41 = vrot.slane %v1244_v45, 2 }
 0x137   : > { %v1096_v50 = vadd.f32 %v1095_v46, %v1094_v39  ;;  %v1934_v52 = vadd.f32 %v1209_v13, %v1208_v19  ;;  %v1128_v53 = vadd.f32 %v1127_v38, %v1126_v42  ;;  %v1240_v24 = vadd.f32 %v1239_v35, %v1238_v22 }
 0x138   : > { %v1102_v55 = vadd.f32 %v1101_v47, %v1100_v29  ;;  %v1936_v30 = vadd.f32 %v1215_v49, %v1214_v43  ;;  %v1134_v54 = vadd.f32 %v1133_v0, %v1132_v44  ;;  %v1246_v61 = vadd.f32 %v1245_v41, %v1244_v45 }
 0x139   : > { %v1112_v62 = vsel %vm1111_vm3, %v1096_v50, %v1110_v58  ;;  %v1129_v40 = vrot.slane %v1128_v53, 1  ;;  %v1241_v2 = vrot.slane %v1240_v24, 1  ;;  %v1121_v5 = vmul.f32 %v1010_v56, %v1871_v1 }
 0x13a   : > { %v1943_v6 = vadd.f32 %v1112_v62, %v1054_v48  ;;  %v1114_v7 = vsel %vm1111_vm3, %v1102_v55, %v1113_v21  ;;  %v1135_v8 = vrot.slane %v1134_v54, 1  ;;  %v1247_v11 = vrot.slane %v1246_v61, 1 }
 0x13b   : > { %v1949_v12 = vadd.f32 %v1114_v7, %v1058_v51  ;;  %v1130_v14 = vadd.f32 %v1129_v40, %v1128_v53  ;;  %v1951_v58 = vadd.f32 %v1241_v2, %v1240_v24  ;;  %v1137_v26 = vrot.slane %v1121_v5, 4 }
 0x13c   : > { %v1136_v15 = vadd.f32 %v1135_v8, %v1134_v54  ;;  %v1953_v56 = vadd.f32 %v1247_v11, %v1246_v61  ;;  %v1233_v27 = vmul.f32 %v1916_v57, %v1886_v16  ;;  %v1122_v48 = vmul.f32 %v1922_v63, %v1890_v20 }
 0x13d   : > { %v1138_v21 = vadd.f32 %v1137_v26, %v1121_v5  ;;  %v1234_v17 = vmul.f32 %v1924_v60, %v1892_v25  ;;  %v1123_v37 = vmul.f32 %v1014_v3, %v1871_v1  ;;  %v1235_v28 = vmul.f32 %v1044_v4, %v1886_v16 }
 0x13e   : > { %v1249_v51 = vrot.slane %v1233_v27, 4  ;;  %v1143_v18 = vrot.slane %v1122_v48, 4  ;;  %v1124_v23 = vmul.f32 %v1016_v9, %v1890_v20  ;;  %v1236_v31 = vmul.f32 %v1046_v10, %v1892_v25 }
 0x13f   : > { %v1139_v32 = vrot.slane %v1138_v21, 2  ;;  %v1255_v34 = vrot.slane %v1234_v17, 4  ;;  %v1149_v57 = vrot.slane %v1123_v37, 4  ;;  %v1261_v36 = vrot.slane %v1235_v28, 4 }
 0x140   : > { %v1250_v39 = vadd.f32 %v1249_v51, %v1233_v27  ;;  %v1144_v63 = vadd.f32 %v1143_v18, %v1122_v48  ;;  %v1155_v19 = vrot.slane %v1124_v23, 4  ;;  %v1267_v42 = vrot.slane %v1236_v31, 4 }
 0x141   : > { %v1140_v22 = vadd.f32 %v1139_v32, %v1138_v21  ;;  %v1256_v60 = vadd.f32 %v1255_v34, %v1234_v17  ;;  %v1150_v29 = vadd.f32 %v1149_v57, %v1123_v37  ;;  %v1262_v1 = vadd.f32 %v1261_v36, %v1235_v28 }
 0x142   : > { %v1251_v3 = vrot.slane %v1250_v39, 2  ;;  %v1145_v16 = vrot.slane %v1144_v63, 2  ;;  %v1156_v4 = vadd.f32 %v1155_v19, %v1124_v23  ;;  %v1268_v43 = vadd.f32 %v1267_v42, %v1236_v31 }
 0x143   : > { %v1141_v44 = vrot.slane %v1140_v22, 1  ;;  %v1257_v20 = vrot.slane %v1256_v60, 2  ;;  %v1151_v9 = vrot.slane %v1150_v29, 2  ;;  %v1263_v25 = vrot.slane %v1262_v1, 2 }
 0x144   : > { %v1252_v10 = vadd.f32 %v1251_v3, %v1250_v39  ;;  %v1146_v45 = vadd.f32 %v1145_v16, %v1144_v63  ;;  %v1157_v46 = vrot.slane %v1156_v4, 2  ;;  %v1269_v13 = vrot.slane %v1268_v43, 2 }
 0x145   : > { %v1142_v38 = vadd.f32 %v1141_v44, %v1140_v22  ;;  %v1258_v35 = vadd.f32 %v1257_v20, %v1256_v60  ;;  %v1152_v47 = vadd.f32 %v1151_v9, %v1150_v29  ;;  %v1264_v49 = vadd.f32 %v1263_v25, %v1262_v1 }
 0x146   : > { %v1253_v0 = vrot.slane %v1252_v10, 1  ;;  %v1147_v41 = vrot.slane %v1146_v45, 1  ;;  %v1158_v50 = vadd.f32 %v1157_v46, %v1156_v4  ;;  %v1270_v53 = vadd.f32 %v1269_v13, %v1268_v43 }
 0x147   : > { %v1167_v24 = vsel %vm1109_vm2, %v1142_v38, %v1130_v14  ;;  %v1259_v55 = vrot.slane %v1258_v35, 1  ;;  %v1153_v54 = vrot.slane %v1152_v47, 1  ;;  %v1265_v61 = vrot.slane %v1264_v49, 1 }
 0x148   : > { %v1254_v62 = vadd.f32 %v1253_v0, %v1252_v10  ;;  %v1148_v40 = vadd.f32 %v1147_v41, %v1146_v45  ;;  %v1159_v2 = vrot.slane %v1158_v50, 1  ;;  %v1271_v5 = vrot.slane %v1270_v53, 1 }
 0x149   : > { %v1260_v7 = vadd.f32 %v1259_v55, %v1258_v35  ;;  %v1154_v8 = vadd.f32 %v1153_v54, %v1152_v47  ;;  %v1266_v11 = vadd.f32 %v1265_v61, %v1264_v49  ;;  %v1224_v26 = vsel %vm1111_vm3, %v1934_v52, %v1920_v59 }
 0x14a   : > { %v1169_v27 = vsel %vm1109_vm2, %v1148_v40, %v1136_v15  ;;  %v1160_v14 = vadd.f32 %v1159_v2, %v1158_v50  ;;  %v1272_v48 = vadd.f32 %v1271_v5, %v1270_v53  ;;  %v1226_v21 = vsel %vm1111_vm3, %v1936_v30, %v1928_v33 }
 0x14b   : > { %v1168_v17 = vsel %vm1111_vm3, %v1154_v8, %v1167_v24  ;;  %v1279_v37 = vsel %vm1109_vm2, %v1254_v62, %v1951_v58  ;;  %v1281_v28 = vsel %vm1109_vm2, %v1260_v7, %v1953_v56 }
 0x14c   : > { %v1170_v59 = vsel %vm1111_vm3, %v1160_v14, %v1169_v27  ;;  %v1173_v52 = vadd.f32 %v1168_v17, %v1943_v6  ;;  %v1280_v15 = vsel %vm1111_vm3, %v1266_v11, %v1279_v37  ;;  %v1282_v51 = vsel %vm1111_vm3, %v1272_v48, %v1281_v28 }
 0x14d   : > { %v1174_v33 = vadd.f32 %v1170_v59, %v1949_v12 }
 0x14e   : > { %v1229_v30 = vadd.f32 %v1224_v26, %v1173_v52 }
 0x14f   : > { %v1230_v18 = vadd.f32 %v1226_v21, %v1174_v33 }
 0x150   : > { %v1285_v23 = vadd.f32 %v1280_v15, %v1229_v30 }
 0x151   : > { %v1286_v58 = vadd.f32 %v1282_v51, %v1230_v18 }
 0x153   : > { %v1289_v56 = vcombine.low %v1285_v23, %v1286_v58 }
 0x155   : > { %1291 = vst [vmem:[%s223_s11] sm:$0x77] %v1289_v56 }
 0x156   : > { %1497 = shalt.err (!%p1494_p3)
}
 0x157   : > { %s1498_s29 = scalar_lea.hbm %s1990_s20, 128  ;;  %s1502_s6 = scalar_lea.hbm %s2038_s4, 256 }
 0x158   : > { %p1499_p4 = scmp.ne.s32.totalorder %s1990_s20, %s1498_s29  ;;  %p1503_p9 = scmp.lt.u32.totalorder %s1990_s20, %s2038_s4 }
 0x159   : > { %p1504_p10 = scmp.lt.u32.totalorder %s1502_s6, %s1498_s29  ;;  %p1506_p12 = scmp.lt.u32.totalorder %s1498_s29, %s1990_s20 }
 0x15a   : > { %p1500_p7 = pnand %p1499_p4, %p1614_p5 }
 0x15b   : > { %p1505_p11 = por %p1504_p10, %p1503_p9 }
 0x15c   : > { %p1501_p8 = pneg %p1500_p7 }
 0x15d   : > { %p1507_p13 = por %p1506_p12, %p1505_p11 }
 0x15f   : > { %p1508_p0 = pnand %p1507_p13, %p1501_p8 }
 0x161   : > { %1511 = shalt.err (!%p1508_p0)
}
 0x162   : > { %1429 = dma.vmem_to_hbm [thread:$0]  (%p1614_p5), %s1992_s12, 128, %s1990_s20, %s1293_s22  }
 0x163 PF: > { %p1435_p1 = scmp.ge.s32.totalorder %s1546_s18, 2  ;;  %s1319_s9 = sand.u32 1, %s1534_s15  }
 0x164   : > { %s1320_s10 = scalar_lea.sflag [#allocation3], %s1319_s9 }
 0x165   : > { %p1432_p2 = pnand %p1435_p1, %p1618_p6 }
 0x167   : > { %1529 = dma.done.wait (!%p1432_p2), %s1320_s10, 128  }
 0x168   : > { %1531 = vsyncadd (!%p1432_p2), %s1320_s10, 4294967168  ;;  %p14_p3 = scmp.ge.s32.totalorder %s1601_s21, 4   ;;  %s2057_s15 = smov %s1538_s16 }
 0x169   : > { %s2058_s16 = smov %s1542_s17  ;;  %s2059_s17 = smov %s1612_s24 }
 0x16a   : > { %s2060_s18 = smov %s1601_s21  ;;  %16 = sbr.rel (!%p14_p3) target bundleno = 3 (0x3), region = 77 }
 0x171   :  { %1325 = vsyncpa [#allocation3], 1 }
 0x172   :  { %1327 = vsyncpa [#allocation3 + $0x1], 1 }

</bundles_post_ra>
